<compile_context>
chip_gen: v7x
topology: tpu7x:2x2x1
jax: 0.10.0
libtpu: 0.0.40
codegen_flags: <defaults>
</compile_context>

<pallas_src>
import numpy as np
import jax
import jax.numpy as jnp
from jax import lax
from jax.experimental import pallas as pl
from jax.experimental.pallas import tpu as pltpu


def _make_kernel(HWp, NB, center_idx, taps):
    f32 = jnp.float32

    def kernel(x_ref, wpl_ref, b1_ref, wpw_ref, b2_ref, out_ref, y1_ref):
        # ---- depthwise KxK (BN folded) + ReLU, one image at a time ---------
        # fori_loop (not a static Python for) so live ranges are bounded to
        # one image's (Cin, HWp) working set -> no vreg spills at real shapes.
        def dw_body(n, carry):
            x = x_ref[n].astype(f32)                          # (Cin, HWp)
            acc = x * wpl_ref[center_idx]                     # center tap
            for t, sh in taps:                                # K*K-1 taps, static
                # shifted[..., p] == x[..., p + s]; out-of-image taps are
                # already zeroed inside the precomputed weight plane.
                acc = acc + pltpu.roll(x, shift=sh, axis=1) * wpl_ref[t]
            y1 = jnp.maximum(acc + b1_ref[...], 0.0)
            off = pl.multiple_of(n * HWp, 128)                # aligned lane slice
            y1_ref[:, pl.ds(off, HWp)] = y1.astype(y1_ref.dtype)
            return carry

        lax.fori_loop(0, NB, dw_body, 0)

        # ---- pointwise 1x1 (BN folded) + ReLU: ONE big MXU matmul ----------
        y2 = jnp.dot(wpw_ref[...], y1_ref[...],               # (Cout, NB*HWp)
                     preferred_element_type=f32)
        y2 = jnp.maximum(y2 + b2_ref[...], 0.0)
        for n in range(NB):                                   # static lane slices
            out_ref[n] = y2[:, n * HWp:(n + 1) * HWp].astype(out_ref.dtype)

    return kernel


def _masked_tap_planes(H, W, HWp, K):
    """(K*K, 1, HWp) float32 SAME-padding boundary masks; pad lanes zeroed."""
    HW = H * W
    R = K // 2
    lane = np.arange(HWp)
    col = lane % W
    row = lane // W
    valid = lane < HW
    planes = []
    for kh in range(K):
        dh = kh - R
        for kw in range(K):
            dw = kw - R
            m = valid.copy()
            if dw < 0:
                m = m & (col >= -dw)
            if dw > 0:
                m = m & (col < W - dw)
            if dh < 0:
                m = m & (row >= -dh)
            if dh > 0:
                m = m & (row < H - dh)
            planes.append(m)
    return np.stack(planes).astype(np.float32).reshape(K * K, 1, HWp)


def conv_dw_forward(x_nchw, params, *, kernel_size=3, stride=1, io_dtype=None):
    if stride != 1:
        raise NotImplementedError("stride > 1 not implemented")  # TODO(synk)
    assert kernel_size % 2 == 1, "even kernel_size not supported"
    N, Cin, H, W = x_nchw.shape
    K = kernel_size
    KK = K * K
    Cout = params["wpw"].shape[0]
    HW = H * W
    HWp = ((HW + 127) // 128) * 128          # lane-dense spatial dim
    io_dtype = jnp.dtype(x_nchw.dtype if io_dtype is None else io_dtype)

    # Per-tap weight planes: boundary mask * folded depthwise weight, so each
    # in-kernel tap is mul+add (no compares, no per-tap (Cin,1) broadcasts).
    mask = jnp.asarray(_masked_tap_planes(H, W, HWp, K))              # (KK,1,HWp)
    wplanes = (mask * params["wdw"].reshape(KK, Cin, 1)).astype(jnp.float32)

    x = x_nchw.reshape(N, Cin, HW)           # free reshape, H*W -> lanes
    if HWp != HW:
        x = jnp.pad(x, ((0, 0), (0, 0), (0, HWp - HW)))
    x = x.astype(io_dtype)
    b1 = params["b1"].reshape(Cin, 1).astype(jnp.float32)
    wpw = params["wpw"].astype(io_dtype)                              # (Cout, Cin)
    b2 = params["b2"].reshape(Cout, 1).astype(jnp.float32)

    # --- generation-aware sizing: biggest NB that fits VMEM, grid >= 2 -------
    try:
        vmem_cap = int(pltpu.get_tpu_info().vmem_capacity_bytes)
    except Exception:
        vmem_cap = 64 * 1024 * 1024                                   # v7x floor
    io_bytes = io_dtype.itemsize
    budget = int(vmem_cap * 0.45)
    fixed = (2 * KK * Cin * HWp * 4          # resident weight planes (2 buffers)
             + 2 * Cout * max(Cin, 128) * 4  # wpw
             + 4 * (Cin + Cout) * 128 * 4    # biases (lane-padded)
             + (1 << 20))
    per_img = 2 * (Cin + Cout) * HWp * io_bytes + Cin * HWp * io_bytes
    cap = max(1, (budget - fixed) // per_img) if budget > fixed else 1
    if N >= 2:
        cap = min(cap, max(1, N // 2))       # grid >= 2 -> both v7x TCs get work
    NB = 1
    for nb in range(int(min(cap, N)), 0, -1):
        if N % nb == 0:
            NB = nb
            break
    footprint = fixed + NB * per_img
    vmem_limit = int(max(min(0.9 * vmem_cap, 2 * footprint + (8 << 20)), 1 << 24))

    # Tap list: (plane index, lane roll shift) for every non-center tap.
    R = K // 2
    taps = []
    for kh in range(K):
        for kw in range(K):
            if kh == R and kw == R:
                continue
            s = (kh - R) * W + (kw - R)
            taps.append((kh * K + kw, (-s) % HWp))
    center_idx = R * K + R

    kern = _make_kernel(HWp, NB, center_idx, taps)

    out = pl.pallas_call(
        kern,
        out_shape=jax.ShapeDtypeStruct((N, Cout, HWp), io_dtype),
        grid_spec=pltpu.PrefetchScalarGridSpec(
            num_scalar_prefetch=0,
            grid=(N // NB,),
            in_specs=[
                pl.BlockSpec((NB, Cin, HWp), lambda n: (n, 0, 0)),
                pl.BlockSpec((KK, Cin, HWp), lambda n: (0, 0, 0)),   # resident
                pl.BlockSpec((Cin, 1), lambda n: (0, 0)),
                pl.BlockSpec((Cout, Cin), lambda n: (0, 0)),
                pl.BlockSpec((Cout, 1), lambda n: (0, 0)),
            ],
            out_specs=pl.BlockSpec((NB, Cout, HWp), lambda n: (n, 0, 0)),
            scratch_shapes=[pltpu.VMEM((Cin, NB * HWp), io_dtype)],   # y1
        ),
        compiler_params=pltpu.CompilerParams(
            dimension_semantics=("parallel",),
            vmem_limit_bytes=vmem_limit),
    )(x, wplanes, b1, wpw, b2)

    if HWp != HW:
        out = out[:, :, :HW]
    return out.reshape(N, Cout, H, W)


def make_params(key, inp, oup, kernel_size=3, eps=1e-5):
    """Deterministic conv weights + eval-mode BN, folded into (weight, bias)."""
    ks = jax.random.split(key, 4)

    def bn_fold(k, C):
        kg, kb, km, kv = jax.random.split(k, 4)
        gamma = 1.0 + 0.1 * jax.random.normal(kg, (C,), jnp.float32)
        beta = 0.1 * jax.random.normal(kb, (C,), jnp.float32)
        mean = 0.1 * jax.random.normal(km, (C,), jnp.float32)
        var = jnp.abs(jax.random.normal(kv, (C,), jnp.float32)) + 0.5
        scale = gamma / jnp.sqrt(var + eps)
        shift = beta - mean * scale
        return scale, shift

    w_dw = 0.2 * jax.random.normal(ks[0], (kernel_size, kernel_size, inp),
                                   jnp.float32)
    w_pw = 0.2 * jax.random.normal(ks[1], (oup, inp), jnp.float32)
    s1, sh1 = bn_fold(ks[2], inp)
    s2, sh2 = bn_fold(ks[3], oup)

    return {
        "wdw": w_dw * s1, "b1": sh1,           # depthwise (K,K,Cin), bias (Cin,)
        "wpw": w_pw * s2[:, None], "b2": sh2,  # pointwise (Cout,Cin), bias (Cout,)
    }


def ref_forward(x_nchw, params, *, kernel_size=3, stride=1):
    """Pure-JAX reference (XLA convs) using the same folded weights."""
    x = jnp.transpose(x_nchw, (0, 2, 3, 1))                      # NHWC
    Cin = x.shape[-1]
    Cout = params["wpw"].shape[0]

    k_dw = params["wdw"].reshape(kernel_size, kernel_size, 1, Cin)
    y = jax.lax.conv_general_dilated(
        x, k_dw, (stride, stride), "SAME",
        dimension_numbers=("NHWC", "HWIO", "NHWC"), feature_group_count=Cin)
    y = jax.nn.relu(y + params["b1"])

    k_pw = jnp.transpose(params["wpw"]).reshape(1, 1, Cin, Cout)
    y = jax.lax.conv_general_dilated(
        y, k_pw, (1, 1), "SAME", dimension_numbers=("NHWC", "HWIO", "NHWC"))
    y = jax.nn.relu(y + params["b2"])
    return jnp.transpose(y, (0, 3, 1, 2))                        # NCHW


if __name__ == "__main__":
    key = jax.random.PRNGKey(0)
    kx, kp = jax.random.split(key)

    N, Cin, Cout, H, W = 2, 4, 8, 16, 16
    x = jax.random.normal(kx, (N, Cin, H, W), jnp.float32)
    params = make_params(kp, Cin, Cout)

    out = jax.block_until_ready(conv_dw_forward(x, params))
    ref = jax.block_until_ready(ref_forward(x, params))

    assert out.shape == (N, Cout, H, W), out.shape
    np.testing.assert_allclose(np.asarray(out), np.asarray(ref),
                               rtol=2e-4, atol=2e-4)
    print("KERNEL_OK")
</pallas_src>

<mosaic_0001>
module attributes {stable_mosaic.version = 11 : i64} {
  func.func @kernel(%arg0: i32, %arg1: memref<1x4x256xf32, #tpu.memory_space<vmem>>, %arg2: memref<9x4x256xf32, #tpu.memory_space<vmem>>, %arg3: memref<4x1xf32, #tpu.memory_space<vmem>>, %arg4: memref<8x4xf32, #tpu.memory_space<vmem>>, %arg5: memref<8x1xf32, #tpu.memory_space<vmem>>, %arg6: memref<1x8x256xf32, #tpu.memory_space<vmem>>, %arg7: memref<4x256xf32, #tpu.memory_space<vmem>>) attributes {dimension_semantics = [#tpu.dimension_semantics<parallel>], iteration_bounds = array<i64: 2>, scalar_prefetch = 0 : i64, scratch_operands = 1 : i64, tpu.core_type = #tpu.core_type<tc>, window_params = [{transform_indices = @transform_0, window_bounds = array<i64: 1, 4, 256>}, {pipeline_mode = #tpu.pipeline_mode<synchronous>, transform_indices = @transform_1, window_bounds = array<i64: 9, 4, 256>}, {pipeline_mode = #tpu.pipeline_mode<synchronous>, transform_indices = @transform_2, window_bounds = array<i64: 4, 1>}, {pipeline_mode = #tpu.pipeline_mode<synchronous>, transform_indices = @transform_3, window_bounds = array<i64: 8, 4>}, {pipeline_mode = #tpu.pipeline_mode<synchronous>, transform_indices = @transform_4, window_bounds = array<i64: 8, 1>}, {transform_indices = @transform_5, window_bounds = array<i64: 1, 8, 256>}]} {
    %c0_i32 = arith.constant 0 : i32
    %0 = arith.index_cast %c0_i32 : i32 to index
    %c0 = arith.constant 0 : index
    %c0_0 = arith.constant 0 : index
    %1 = vector.load %arg1[%0, %c0, %c0_0] : memref<1x4x256xf32, #tpu.memory_space<vmem>>, vector<1x4x256xf32>
    %2 = vector.shape_cast %1 : vector<1x4x256xf32> to vector<4x256xf32>
    %c4 = arith.constant 4 : index
    %c0_1 = arith.constant 0 : index
    %c0_2 = arith.constant 0 : index
    %3 = vector.load %arg2[%c4, %c0_1, %c0_2] : memref<9x4x256xf32, #tpu.memory_space<vmem>>, vector<1x4x256xf32>
    %4 = vector.shape_cast %3 : vector<1x4x256xf32> to vector<4x256xf32>
    %5 = arith.mulf %2, %4 : vector<4x256xf32>
    %c17_i32 = arith.constant 17 : i32
    %6 = tpu.dynamic_rotate %2 by %c17_i32 dim 1 : vector<4x256xf32>, i32 -> vector<4x256xf32>
    %c0_3 = arith.constant 0 : index
    %c0_4 = arith.constant 0 : index
    %c0_5 = arith.constant 0 : index
    %7 = vector.load %arg2[%c0_3, %c0_4, %c0_5] : memref<9x4x256xf32, #tpu.memory_space<vmem>>, vector<1x4x256xf32>
    %8 = vector.shape_cast %7 : vector<1x4x256xf32> to vector<4x256xf32>
    %9 = arith.mulf %6, %8 : vector<4x256xf32>
    %10 = arith.addf %5, %9 : vector<4x256xf32>
    %c16_i32 = arith.constant 16 : i32
    %11 = tpu.dynamic_rotate %2 by %c16_i32 dim 1 : vector<4x256xf32>, i32 -> vector<4x256xf32>
    %c1 = arith.constant 1 : index
    %c0_6 = arith.constant 0 : index
    %c0_7 = arith.constant 0 : index
    %12 = vector.load %arg2[%c1, %c0_6, %c0_7] : memref<9x4x256xf32, #tpu.memory_space<vmem>>, vector<1x4x256xf32>
    %13 = vector.shape_cast %12 : vector<1x4x256xf32> to vector<4x256xf32>
    %14 = arith.mulf %11, %13 : vector<4x256xf32>
    %15 = arith.addf %10, %14 : vector<4x256xf32>
    %c15_i32 = arith.constant 15 : i32
    %16 = tpu.dynamic_rotate %2 by %c15_i32 dim 1 : vector<4x256xf32>, i32 -> vector<4x256xf32>
    %c2 = arith.constant 2 : index
    %c0_8 = arith.constant 0 : index
    %c0_9 = arith.constant 0 : index
    %17 = vector.load %arg2[%c2, %c0_8, %c0_9] : memref<9x4x256xf32, #tpu.memory_space<vmem>>, vector<1x4x256xf32>
    %18 = vector.shape_cast %17 : vector<1x4x256xf32> to vector<4x256xf32>
    %19 = arith.mulf %16, %18 : vector<4x256xf32>
    %20 = arith.addf %15, %19 : vector<4x256xf32>
    %c1_i32 = arith.constant 1 : i32
    %21 = tpu.dynamic_rotate %2 by %c1_i32 dim 1 : vector<4x256xf32>, i32 -> vector<4x256xf32>
    %c3 = arith.constant 3 : index
    %c0_10 = arith.constant 0 : index
    %c0_11 = arith.constant 0 : index
    %22 = vector.load %arg2[%c3, %c0_10, %c0_11] : memref<9x4x256xf32, #tpu.memory_space<vmem>>, vector<1x4x256xf32>
    %23 = vector.shape_cast %22 : vector<1x4x256xf32> to vector<4x256xf32>
    %24 = arith.mulf %21, %23 : vector<4x256xf32>
    %25 = arith.addf %20, %24 : vector<4x256xf32>
    %c255_i32 = arith.constant 255 : i32
    %26 = tpu.dynamic_rotate %2 by %c255_i32 dim 1 : vector<4x256xf32>, i32 -> vector<4x256xf32>
    %c5 = arith.constant 5 : index
    %c0_12 = arith.constant 0 : index
    %c0_13 = arith.constant 0 : index
    %27 = vector.load %arg2[%c5, %c0_12, %c0_13] : memref<9x4x256xf32, #tpu.memory_space<vmem>>, vector<1x4x256xf32>
    %28 = vector.shape_cast %27 : vector<1x4x256xf32> to vector<4x256xf32>
    %29 = arith.mulf %26, %28 : vector<4x256xf32>
    %30 = arith.addf %25, %29 : vector<4x256xf32>
    %c241_i32 = arith.constant 241 : i32
    %31 = tpu.dynamic_rotate %2 by %c241_i32 dim 1 : vector<4x256xf32>, i32 -> vector<4x256xf32>
    %c6 = arith.constant 6 : index
    %c0_14 = arith.constant 0 : index
    %c0_15 = arith.constant 0 : index
    %32 = vector.load %arg2[%c6, %c0_14, %c0_15] : memref<9x4x256xf32, #tpu.memory_space<vmem>>, vector<1x4x256xf32>
    %33 = vector.shape_cast %32 : vector<1x4x256xf32> to vector<4x256xf32>
    %34 = arith.mulf %31, %33 : vector<4x256xf32>
    %35 = arith.addf %30, %34 : vector<4x256xf32>
    %c240_i32 = arith.constant 240 : i32
    %36 = tpu.dynamic_rotate %2 by %c240_i32 dim 1 : vector<4x256xf32>, i32 -> vector<4x256xf32>
    %c7 = arith.constant 7 : index
    %c0_16 = arith.constant 0 : index
    %c0_17 = arith.constant 0 : index
    %37 = vector.load %arg2[%c7, %c0_16, %c0_17] : memref<9x4x256xf32, #tpu.memory_space<vmem>>, vector<1x4x256xf32>
    %38 = vector.shape_cast %37 : vector<1x4x256xf32> to vector<4x256xf32>
    %39 = arith.mulf %36, %38 : vector<4x256xf32>
    %40 = arith.addf %35, %39 : vector<4x256xf32>
    %c239_i32 = arith.constant 239 : i32
    %41 = tpu.dynamic_rotate %2 by %c239_i32 dim 1 : vector<4x256xf32>, i32 -> vector<4x256xf32>
    %c8 = arith.constant 8 : index
    %c0_18 = arith.constant 0 : index
    %c0_19 = arith.constant 0 : index
    %42 = vector.load %arg2[%c8, %c0_18, %c0_19] : memref<9x4x256xf32, #tpu.memory_space<vmem>>, vector<1x4x256xf32>
    %43 = vector.shape_cast %42 : vector<1x4x256xf32> to vector<4x256xf32>
    %44 = arith.mulf %41, %43 : vector<4x256xf32>
    %45 = arith.addf %40, %44 : vector<4x256xf32>
    %c0_20 = arith.constant 0 : index
    %c0_21 = arith.constant 0 : index
    %46 = vector.load %arg3[%c0_20, %c0_21] : memref<4x1xf32, #tpu.memory_space<vmem>>, vector<4x1xf32>
    %47 = vector.broadcast %46 : vector<4x1xf32> to vector<4x256xf32>
    %48 = arith.addf %45, %47 : vector<4x256xf32>
    %cst = arith.constant 0.000000e+00 : f32
    %49 = vector.broadcast %cst : f32 to vector<4x256xf32>
    %50 = arith.maximumf %48, %49 : vector<4x256xf32>
    %c256_i32 = arith.constant 256 : i32
    %51 = arith.muli %c0_i32, %c256_i32 : i32
    %52 = tpu.assume_multiple %51, 128 : i32
    %c0_22 = arith.constant 0 : index
    %53 = arith.index_cast %52 : i32 to index
    %54 = vector.load %arg7[%c0_22, %53] : memref<4x256xf32, #tpu.memory_space<vmem>>, vector<4x256xf32>
    tpu.vector_store %arg7[%c0_22, %53], %50 {strides = array<i32>} : memref<4x256xf32, #tpu.memory_space<vmem>>, vector<4x256xf32>,
    %c1_i32_23 = arith.constant 1 : i32
    %c0_24 = arith.constant 0 : index
    %c0_25 = arith.constant 0 : index
    %55 = vector.load %arg4[%c0_24, %c0_25] : memref<8x4xf32, #tpu.memory_space<vmem>>, vector<8x4xf32>
    %c0_26 = arith.constant 0 : index
    %c0_27 = arith.constant 0 : index
    %56 = vector.load %arg7[%c0_26, %c0_27] : memref<4x256xf32, #tpu.memory_space<vmem>>, vector<4x256xf32>
    %cst_28 = arith.constant dense<0.000000e+00> : vector<8x256xf32>
    %57 = tpu.matmul %55, %56, %cst_28 {dimension_numbers = #tpu.dot_dimension_numbers<[1], [0], [0], [1], [0, 0, 1, 1], [], []>} : vector<8x4xf32>, vector<4x256xf32>, vector<8x256xf32> -> vector<8x256xf32>
    %c0_29 = arith.constant 0 : index
    %c0_30 = arith.constant 0 : index
    %58 = vector.load %arg5[%c0_29, %c0_30] : memref<8x1xf32, #tpu.memory_space<vmem>>, vector<8x1xf32>
    %59 = vector.broadcast %58 : vector<8x1xf32> to vector<8x256xf32>
    %60 = arith.addf %57, %59 : vector<8x256xf32>
    %cst_31 = arith.constant 0.000000e+00 : f32
    %61 = vector.broadcast %cst_31 : f32 to vector<8x256xf32>
    %62 = arith.maximumf %60, %61 : vector<8x256xf32>
    %c0_32 = arith.constant 0 : index
    %c0_33 = arith.constant 0 : index
    %c0_34 = arith.constant 0 : index
    %63 = vector.load %arg6[%c0_32, %c0_33, %c0_34] : memref<1x8x256xf32, #tpu.memory_space<vmem>>, vector<1x8x256xf32>
    %64 = vector.shape_cast %63 : vector<1x8x256xf32> to vector<8x256xf32>
    %65 = vector.shape_cast %62 : vector<8x256xf32> to vector<1x8x256xf32>
    tpu.vector_store %arg6[%c0_32, %c0_33, %c0_34], %65 {strides = array<i32>} : memref<1x8x256xf32, #tpu.memory_space<vmem>>, vector<1x8x256xf32>,
    return
  }
  func.func @transform_0(%arg0: i32) -> (i32, i32, i32) {
    %c0_i32 = arith.constant 0 : i32
    %c0_i32_0 = arith.constant 0 : i32
    %c0_i32_1 = arith.constant 0 : i32
    return %arg0, %c0_i32, %c0_i32_0 : i32, i32, i32
  }
  func.func @transform_1(%arg0: i32) -> (i32, i32, i32) {
    %c0_i32 = arith.constant 0 : i32
    %c0_i32_0 = arith.constant 0 : i32
    %c0_i32_1 = arith.constant 0 : i32
    %c0_i32_2 = arith.constant 0 : i32
    return %c0_i32, %c0_i32_0, %c0_i32_1 : i32, i32, i32
  }
  func.func @transform_2(%arg0: i32) -> (i32, i32) {
    %c0_i32 = arith.constant 0 : i32
    %c0_i32_0 = arith.constant 0 : i32
    %c0_i32_1 = arith.constant 0 : i32
    return %c0_i32, %c0_i32_0 : i32, i32
  }
  func.func @transform_3(%arg0: i32) -> (i32, i32) {
    %c0_i32 = arith.constant 0 : i32
    %c0_i32_0 = arith.constant 0 : i32
    %c0_i32_1 = arith.constant 0 : i32
    return %c0_i32, %c0_i32_0 : i32, i32
  }
  func.func @transform_4(%arg0: i32) -> (i32, i32) {
    %c0_i32 = arith.constant 0 : i32
    %c0_i32_0 = arith.constant 0 : i32
    %c0_i32_1 = arith.constant 0 : i32
    return %c0_i32, %c0_i32_0 : i32, i32
  }
  func.func @transform_5(%arg0: i32) -> (i32, i32, i32) {
    %c0_i32 = arith.constant 0 : i32
    %c0_i32_0 = arith.constant 0 : i32
    %c0_i32_1 = arith.constant 0 : i32
    return %arg0, %c0_i32, %c0_i32_0 : i32, i32, i32
  }
}

</mosaic_0001>

<bundles_post_ra>
// kernel: tpu_custom_call.1
= control target key start
LH: loop header
LB: loop body
LE: loop exit
PB: predicated region body
PF: predicated region fallthrough
CT: control target
= control target key end

     0   :  { %10 = vsyncpa [#allocation4], 0  ;;  %s983_s0 = inlined_call_operand.vmem [shape: f32[2,4,256], index: 0, kind: input, shape index: {}]   ;;  %s984_s1 = inlined_call_operand.hbm [shape: f32[9,4,256], index: 1, kind: input, shape index: {}]   ;;  %s985_s2 = inlined_call_operand.vmem [shape: f32[4,1], index: 2, kind: input, shape index: {}]   ;;  %s986_s3 = inlined_call_operand.vmem [shape: f32[8,4], index: 3, kind: input, shape index: {}]   ;;  %s987_s4 = inlined_call_operand.vmem [shape: f32[8,1], index: 4, kind: input, shape index: {}]   ;;  %s988_s5 = inlined_call_operand.hbm [shape: f32[2,8,256], index: 5, kind: output, shape index: {}]  }
   0x1   :  { %11 = vsyncpa [#allocation5], 0 }
   0x2   :  { %13 = vsyncpa [#allocation5 + $0x1], 0  ;;  %s827_s18 = smov 0   ;;  %s829_s19 = smov 0  }
   0x3   :  { %s831_s20 = smov 0   ;;  %s833_s21 = smov 0  }
   0x4 LB: > { %s848_s22 = sadd.s32 4294967295, %s780_s21   ;;  %s594_s23 = sadd.s32 4294967294, %s780_s21   ;;  %s780_s21 = sphi %s833_s21, %s1004_s21   ;;  %s776_s20 = sphi %s831_s20, %s1003_s20   ;;  %s772_s19 = sphi %s829_s19, %s1002_s19   ;;  %s768_s18 = sphi %s827_s18, %s1001_s18  }
   0x5   : > { %s852_s24 = sadd.s32 1, %s780_s21   ;;  %s136_s25 = sadd.s32 1, %s776_s20 }
   0x6   : > { %s133_s26 = ssub.s32 %s780_s21, %s852_s24  ;;  %p146_p0 = scmp.ne.s32.totalorder %s776_s20, %s772_s19 }
   0x7   : > { %p134_p1 = scmp.eq.s32.totalorder %s133_s26, 0  ;;  %p147_p2 = scmp.eq.s32.totalorder %s848_s22, 1 }
   0x8   : > { %p152_p3 = scmp.ne.s32.totalorder %s772_s19, %s768_s18  ;;  %p153_p4 = scmp.eq.s32.totalorder %s594_s23, 1 }
   0x9   : > { %s863_s27 = scalar_select %p134_p1, %s776_s20, %s136_s25  }
   0xa   : > { %p865_p5 = por %p147_p2, %p146_p0  ;;  %p869_p6 = por %p153_p4, %p152_p3 }
   0xb   : > { %p595_p7 = scmp.ge.s32.totalorder %s780_s21, 1  ;;  %p160_p8 = scmp.lt.s32.totalorder %s780_s21, 3 }
   0xc   : > { %s992_s28 = scalar_select %p865_p5, 1, 0 }
   0xd   : > { %s993_s29 = scalar_select %p869_p6, 1, 0 }
   0xe   : > { %p989_p9 = scmp.eq.s32.totalorder %s848_s22, 0  ;;  %p876_p10 = pnand %p595_p7, %p160_p8 }
   0xf   : > { %s782_s6 = smov [#allocation3]   ;;  %s686_s11 = scalar_lea.hbm %s984_s1, 1152 }
  0x10   : > { %s994_s30 = scalar_select %p876_p10, 1, 0 }
  0x11   : > { %s172_s7 = sshll.u32 %s782_s6, 4  ;;  %p619_p11 = pneg %p876_p10  ;;  %s173_s7 = int_to_ptr.vmem [resolvable:$true] %s172_s7 }
  0x12   : > { %p687_p13 = scmp.ne.s32.totalorder %s984_s1, %s686_s11  ;;  %p693_p3 = scmp.lt.u32.totalorder %s686_s11, %s984_s1 }
  0x13   : > { %p884_p12 = pnand %p989_p9, %p619_p11 }
  0x15   : > { %p688_p0 = pneg %p884_p12 }
  0x17   : > { %p689_p1 = pnand %p688_p0, %p687_p13 }
  0x19   : > { %p690_p2 = pneg %p689_p1 }
  0x1b   : > { %p695_p4 = pnand %p693_p3, %p690_p2 }
  0x1d   : > { %698 = shalt.err (!%p695_p4)
}
  0x1e   : > { %s699_s16 = scalar_lea.vmem %s173_s7, 1152  ;;  %p707_p9 = scmp.lt.s32.totalorder %s173_s7, %s173_s7 }
  0x1f   : > { %p700_p7 = scmp.ne.s32.totalorder %s173_s7, %s699_s16  ;;  %p708_p6 = scmp.lt.s32.totalorder %s699_s16, %s699_s16 }
  0x21   : > { %p702_p8 = pnand %p700_p7, %p688_p0  ;;  %p709_p5 = por %p708_p6, %p707_p9 }
  0x23   : > { %p703_p11 = pneg %p702_p8 }
  0x25   : > { %p710_p10 = pnand %p709_p5, %p703_p11 }
  0x27   : > { %713 = shalt.err (!%p710_p10)
}
  0x28   : > { %s783_s17 = smov 128   ;;  %s784_s23 = smov 8  }
  0x29   : > { %622 = dma.hbm_to_vmem [thread:$0]  (!%p884_p12), %s984_s1, 1152, %s173_s7, [#allocation4], %s783_s17, %s783_s17, %s784_s23  }
  0x2a   : > { %p996_p13 = scmp.ne.s32.totalorder %s994_s30, 0 }
  0x2b   : > { %p997_p1 = scmp.eq.s32.totalorder (!%p996_p13), %s848_s22, 0 }
  0x2c   : > { %205 = sbr.rel (%p996_p13) target bundleno = 456 (0x1c8), region = 40 }
  0x33   : > { %759 = dma.done.wait (%p997_p1), [#allocation4], 1152   ;;  %p998_p0 = pmov %p997_p1 }
  0x34   : > { %p233_p5 = scmp.lt.s32.totalorder %s848_s22, 1  ;;  %v785_v0 = vmov 0   ;;  %s786_s30 = smov 16   ;;  %v398_v3 = vld [vmem:[%s985_s2] sm:$0xf]  ;;  %v794_v5 = vmov 0.0   ;;  %v249_v8 = vlaneseq }
  0x35   : > { %761 = vsyncadd (%p998_p0), [#allocation4], 4294966144  ;;  %676 = vset.pattern.permute.xlu0 %v785_v0  ;;  %s787_s11 = smov 17   ;;  %s788_s12 = smov 15   ;;  %v416_v4 = vld [vmem:[%s987_s4] sm:$0xff]  ;;  %497 = vmatprep.mubr.f32.mxu0 %v794_v5  ;;  %v273_v18 = vld [vmem:[#allocation3 + $0x8] sm:$0xff] }
  0x36   : > { %s234_s6 = scalar_select %p233_p5, %s848_s22, 1  ;;  %v922_v10 = vand.u32 127, %v249_v8  ;;  %v254_v12 = vld [vmem:[#allocation3] sm:$0xff]  ;;  %v275_v24 = vcombine.high %v273_v18, %v273_v18  ;;  %v292_v27 = vld [vmem:[#allocation3 + $0x10] sm:$0xff]  ;;  %v311_v35 = vld [vmem:[#allocation3 + $0x18] sm:$0xff]  ;;  %vm428_vm8 = vcmask 1043456  }
  0x37   : > { %s789_s13 = smov 1   ;;  %s790_s14 = smov 127   ;;  %v256_v14 = vcombine.high %v254_v12, %v254_v12  ;;  %v240_v23 = vld [vmem:[#allocation3 + $0x20] sm:$0xff]  ;;  %v294_v34 = vcombine.high %v292_v27, %v292_v27  ;;  %v313_v41 = vcombine.high %v311_v35, %v311_v35  ;;  %v330_v42 = vld [vmem:[#allocation3 + $0x28] sm:$0xff]  ;;  %v349_v46 = vld [vmem:[#allocation3 + $0x30] sm:$0xff]  ;;  %vm424_vm9 = vcmask 31744  }
  0x38   : > { %s611_s8 = sshll.u32 %s234_s6, 3  ;;  %s791_s15 = smov 113   ;;  %vm251_vm0 = vcmp.lt.s32.totalorder %v922_v10, 17  ;;  %vm269_vm1 = vcmp.lt.s32.totalorder %v922_v10, 16  ;;  %vm288_vm2 = vcmp.lt.s32.totalorder %v922_v10, 15  ;;  %vm307_vm3 = vcmp.lt.s32.totalorder %v922_v10, 1 }
  0x39   : > { %s237_s7 = scalar_lea.vmem %s983_s0, %s611_s8  ;;  %s792_s16 = smov 112   ;;  %vm326_vm4 = vcmp.lt.s32.totalorder %v922_v10, 127  ;;  %v332_v50 = vcombine.high %v330_v42, %v330_v42  ;;  %vm345_vm5 = vcmp.lt.s32.totalorder %v922_v10, 113  ;;  %v351_v54 = vcombine.high %v349_v46, %v349_v46  ;;  %v368_v55 = vld [vmem:[#allocation3 + $0x38] sm:$0xff]  ;;  %v387_v60 = vld [vmem:[#allocation3 + $0x40] sm:$0xff] }
  0x3a   : > { %v238_v1 = vld [vmem:[%s237_s7] sm:$0xff]  ;;  %s793_s25 = smov 111   ;;  %vm364_vm6 = vcmp.lt.s32.totalorder %v922_v10, 112  ;;  %vm383_vm7 = vcmp.lt.s32.totalorder %v922_v10, 111  ;;  %s230_s10 = sand.u32 1, %s772_s19  }
  0x3b   : > { %265 = vrot.lane.b32.xlu1 %v238_v1, %s786_s30  ;;  %245 = vrot.lane.b32.xlu0 %v238_v1, %s787_s11  ;;  %v243_v2 = vcombine.high %v238_v1, %v238_v1  ;;  %v241_v28 = vmul.f32 %v240_v23, %v238_v1  ;;  %s600_s7 = sshll.u32 %s230_s10, 4  ;;  %p999_p9 = scmp.ne.s32.totalorder %s992_s28, 0 }
  0x3f   : > { %284 = vrot.lane.b32.xlu0 %v238_v1, %s788_s12  ;;  %267 = vrot.lane.b32.xlu1 %v243_v2, %s786_s30  ;;  %s612_s30 = sshll.u32 %s848_s22, 8  ;;  %s796_s22 = smov [#allocation6]  }
  0x40   : > { %s718_s23 = sshll.u32 %s796_s22, 4  ;;  %s719_s23 = int_to_ptr.vmem [resolvable:$false] %s718_s23 }
  0x43   : > { %286 = vrot.lane.b32.xlu1 %v243_v2, %s788_s12  ;;  %247 = vrot.lane.b32.xlu0 %v243_v2, %s787_s11  ;;  %s232_s11 = scalar_lea.vmem [#allocation6], %s600_s7 }
  0x44   : > { %s523_s12 = sshll.u32 %s232_s11, 4  ;;  %s943_s12 = int_to_ptr.vmem [resolvable:$true] %s523_s12 }
  0x45   : > { %s714_s17 = scalar_lea.vmem %s943_s12, 256  ;;  %p721_p2 = scmp.lt.s32.totalorder %s943_s12, %s719_s23 }
  0x46   : > { %p715_p6 = scmp.ne.s32.totalorder %s943_s12, %s714_s17 }
  0x47   : > { %305 = vrot.lane.b32.xlu1 %v243_v2, %s789_s13  ;;  %303 = vrot.lane.b32.xlu0 %v238_v1, %s789_s13 }
  0x48   : > { %p716_p10 = pnand %p715_p6, %p999_p9 }
  0x4a   : > { %p717_p12 = pneg %p716_p10 }
  0x4b   : > { %324 = vrot.lane.b32.xlu1 %v243_v2, %s790_s14  ;;  %322 = vrot.lane.b32.xlu0 %v238_v1, %s790_s14 }
  0x4f   : > { %343 = vrot.lane.b32.xlu1 %v243_v2, %s791_s15  ;;  %341 = vrot.lane.b32.xlu0 %v238_v1, %s791_s15  ;;  %s941_s15 = scalar_lea.hbm %s988_s5, %s612_s30 }
  0x53   : > { %362 = vrot.lane.b32.xlu1 %v243_v2, %s792_s16  ;;  %360 = vrot.lane.b32.xlu0 %v238_v1, %s792_s16  ;;  %s509_s16 = scalar_lea.sflag [#allocation5], %s230_s10 }
  0x57   : > { %379 = vrot.lane.b32.xlu1 %v238_v1, %s793_s25  ;;  %401 = vperm.xlu0 %676, %v398_v3  }
  0x5b   : > { %381 = vrot.lane.b32.xlu1 %v243_v2, %s793_s25  ;;  %419 = vperm.xlu0 %676, %v416_v4   ;;  %v370_v2 = vcombine.high %v368_v55, %v368_v55  ;;  %s720_s25 = scalar_lea.vmem %s719_s23, 512 }
  0x5c   : > { %p722_p3 = scmp.lt.s32.totalorder %s720_s25, %s714_s17 }
  0x5e   : > { %p723_p4 = por %p722_p3, %p721_p2 }
  0x60   : > { %p724_p7 = pnand %p723_p4, %p717_p12 }
  0xad   : > { %v266_v6 = vpop.permute.xlu1 %265  ;;  %v246_v7 = vpop.permute.xlu0 %245 }
  0xb1   : > { %v285_v9 = vpop.permute.xlu0 %284  ;;  %v268_v11 = vpop.permute.xlu1 %267 }
  0xb2   : > { %v270_v25 = vsel %vm269_vm1, %v266_v6, %v268_v11  ;;  %v271_v26 = vsel %vm269_vm1, %v268_v11, %v266_v6  ;;  %v389_v6 = vcombine.high %v387_v60, %v387_v60 }
  0xb3   : > { %v277_v32 = vmul.f32 %v273_v18, %v271_v26  ;;  %v278_v33 = vmul.f32 %v275_v24, %v270_v25 }
  0xb5   : > { %v287_v13 = vpop.permute.xlu1 %286  ;;  %v248_v15 = vpop.permute.xlu0 %247  ;;  %v281_v43 = vcombine.low %v277_v32, %v278_v33 }
  0xb6   : > { %v252_v16 = vsel %vm251_vm0, %v246_v7, %v248_v15  ;;  %v253_v17 = vsel %vm251_vm0, %v248_v15, %v246_v7  ;;  %v289_v36 = vsel %vm288_vm2, %v285_v9, %v287_v13  ;;  %v290_v37 = vsel %vm288_vm2, %v287_v13, %v285_v9 }
  0xb7   : > { %v258_v19 = vmul.f32 %v254_v12, %v253_v17  ;;  %v259_v20 = vmul.f32 %v256_v14, %v252_v16  ;;  %v296_v44 = vmul.f32 %v292_v27, %v290_v37  ;;  %v297_v45 = vmul.f32 %v294_v34, %v289_v36 }
  0xb8   : > { %v795_v12 = vmov 839922192  }
  0xb9   : > { %v306_v21 = vpop.permute.xlu1 %305  ;;  %v304_v22 = vpop.permute.xlu0 %303  ;;  %v262_v29 = vcombine.low %v258_v19, %v259_v20  ;;  %v300_v56 = vcombine.low %v296_v44, %v297_v45  ;;  %v404_v13 = vunpack.c.l.s4 %v795_v12 }
  0xba   : > { %v308_v47 = vsel %vm307_vm3, %v304_v22, %v306_v21  ;;  %v309_v48 = vsel %vm307_vm3, %v306_v21, %v304_v22  ;;  %v407_v21 = vshrl.u32 %v249_v8, 7  ;;  %v414_v8 = vld [vmem:[%s986_s3] sm:$0xff] }
  0xbb   : > { %v264_v38 = vadd.f32 %v262_v29, %v241_v28  ;;  %v315_v57 = vmul.f32 %v311_v35, %v309_v48  ;;  %v316_v58 = vmul.f32 %v313_v41, %v308_v47  ;;  %v405_v25 = vunpack.c.0.s8 %v404_v13 }
  0xbd   : > { %v325_v30 = vpop.permute.xlu1 %324  ;;  %v323_v31 = vpop.permute.xlu0 %322  ;;  %v283_v49 = vadd.f32 %v281_v43, %v264_v38  ;;  %v319_v7 = vcombine.low %v315_v57, %v316_v58  ;;  %v408_v29 = vsub.s32 %v405_v25, %v407_v21 }
  0xbe   : > { %v327_v52 = vsel %vm326_vm4, %v323_v31, %v325_v30  ;;  %v328_v53 = vsel %vm326_vm4, %v325_v30, %v323_v31 }
  0xbf   : > { %v302_v63 = vadd.f32 %v300_v56, %v283_v49  ;;  %v334_v0 = vmul.f32 %v330_v42, %v327_v52  ;;  %v335_v1 = vmul.f32 %v332_v50, %v328_v53 }
  0xc1   : > { %v344_v39 = vpop.permute.xlu1 %343  ;;  %v342_v40 = vpop.permute.xlu0 %341  ;;  %v321_v14 = vadd.f32 %v319_v7, %v302_v63  ;;  %v338_v15 = vcombine.low %v334_v0, %v335_v1 }
  0xc2   : > { %v346_v61 = vsel %vm345_vm5, %v342_v40, %v344_v39  ;;  %v347_v62 = vsel %vm345_vm5, %v344_v39, %v342_v40 }
  0xc3   : > { %v353_v9 = vmul.f32 %v349_v46, %v346_v61  ;;  %v354_v11 = vmul.f32 %v351_v54, %v347_v62  ;;  %v340_v10 = vadd.f32 %v338_v15, %v321_v14 }
  0xc5   : > { %v363_v51 = vpop.permute.xlu1 %362  ;;  %v361_v59 = vpop.permute.xlu0 %360  ;;  %v357_v22 = vcombine.low %v353_v9, %v354_v11 }
  0xc6   : > { %v365_v4 = vsel %vm364_vm6, %v361_v59, %v363_v51  ;;  %v366_v5 = vsel %vm364_vm6, %v363_v51, %v361_v59 }
  0xc7   : > { %v372_v16 = vmul.f32 %v368_v55, %v365_v4  ;;  %v373_v17 = vmul.f32 %v370_v2, %v366_v5  ;;  %v359_v27 = vadd.f32 %v357_v22, %v340_v10 }
  0xc9   : > { %v380_v3 = vpop.permute.xlu1 %379  ;;  %v376_v26 = vcombine.low %v372_v16, %v373_v17 }
  0xcb   : > { %v378_v30 = vadd.f32 %v376_v26, %v359_v27 }
  0xcd   : > { %v382_v18 = vpop.permute.xlu1 %381 }
  0xce   : > { %v384_v19 = vsel %vm383_vm7, %v380_v3, %v382_v18  ;;  %v385_v20 = vsel %vm383_vm7, %v382_v18, %v380_v3 }
  0xcf   : > { %v391_v23 = vmul.f32 %v387_v60, %v384_v19  ;;  %v392_v24 = vmul.f32 %v389_v6, %v385_v20 }
  0xd1   : > { %v395_v28 = vcombine.low %v391_v23, %v392_v24 }
  0xd3   : > { %v397_v32 = vadd.f32 %v395_v28, %v378_v30 }
  0xd6   : > { %v402_v31 = vpop.permute.xlu0 %401 }
  0xd7   : > { %v409_v33 = vrot.slane %v402_v31, %v408_v29 }
  0xd9   : > { %v411_v34 = vadd.f32 %v409_v33, %v397_v32 }
  0xda   : > { %v420_v37 = vpop.permute.xlu0 %419 }
  0xdb   : > { %v412_v35 = vmax.f32 %v411_v34, 0.0 }
  0xdd   : > { %v423_v36 = vcombine.high %v412_v35, %v412_v35 }
  0xdf   : > { %603 = vmatprep.subr.msk.mxu0 %vm428_vm8, %v423_v36 }
  0xe0   : > { %604 = vmatpush1.msk.msra.mxu0 %vm428_vm8, %v412_v35 }
  0xe1   : > { %605 = vmatmul.mubr.msk.f32.vlgmr.msra.gmra.mrb[0].mxu0 %vm424_vm9, %v414_v8 }
 0x1b4   : > { %v499_v38 = vpop.f32.mrb[0].mxu0 }
 0x1b5   : > { %v500_v39 = vadd.f32 %v499_v38, %v420_v37  ;;  %v501_v40 = vpop.f32.mrb[1].mxu0 }
 0x1b6   : > { %v502_v41 = vadd.f32 %v501_v40, %v420_v37 }
 0x1b7   : > { %v504_v42 = vmax.f32 %v500_v39, 0.0 }
 0x1b8   : > { %v505_v43 = vmax.f32 %v502_v41, 0.0 }
 0x1b9   : > { %506 = vst [vmem:[%s232_s11] sm:$0xff] %v504_v42 }
 0x1ba   : > { %507 = vst [vmem:[%s232_s11 + $0x8] sm:$0xff] %v505_v43 }
 0x1bb   : > { %727 = shalt.err (!%p724_p7)
}
 0x1bc   : > { %s728_s26 = scalar_lea.hbm %s941_s15, 256  ;;  %s732_s9 = scalar_lea.hbm %s988_s5, 512 }
 0x1bd   : > { %p729_p8 = scmp.ne.s32.totalorder %s941_s15, %s728_s26  ;;  %p733_p1 = scmp.lt.u32.totalorder %s941_s15, %s988_s5 }
 0x1be   : > { %p734_p0 = scmp.lt.u32.totalorder %s732_s9, %s728_s26  ;;  %p736_p6 = scmp.lt.u32.totalorder %s728_s26, %s941_s15 }
 0x1bf   : > { %p730_p11 = pnand %p729_p8, %p999_p9 }
 0x1c0   : > { %p735_p5 = por %p734_p0, %p733_p1 }
 0x1c1   : > { %p731_p13 = pneg %p730_p11 }
 0x1c2   : > { %p737_p10 = por %p736_p6, %p735_p5 }
 0x1c4   : > { %p738_p12 = pnand %p737_p10, %p731_p13 }
 0x1c6   : > { %741 = shalt.err (!%p738_p12)
}
 0x1c7   : > { %617 = dma.vmem_to_hbm [thread:$0]  (%p999_p9), %s943_s12, 256, %s941_s15, %s509_s16  }
 0x1c8 PF: > { %p629_p2 = scmp.ge.s32.totalorder %s780_s21, 2  ;;  %s535_s30 = sand.u32 1, %s768_s18  }
 0x1c9   : > { %p1000_p3 = scmp.ne.s32.totalorder %s993_s29, 0  ;;  %s536_s11 = scalar_lea.sflag [#allocation5], %s535_s30 }
 0x1cb   : > { %p624_p4 = pnand %p629_p2, %p1000_p3 }
 0x1cd   : > { %763 = dma.done.wait (!%p624_p4), %s536_s11, 256  }
 0x1ce   : > { %765 = vsyncadd (!%p624_p4), %s536_s11, 4294967040  ;;  %p16_p7 = scmp.ge.s32.totalorder %s852_s24, 4   ;;  %s1001_s18 = smov %s772_s19 }
 0x1cf   : > { %s1002_s19 = smov %s776_s20  ;;  %s1003_s20 = smov %s863_s27 }
 0x1d0   : > { %s1004_s21 = smov %s852_s24  ;;  %18 = sbr.rel (!%p16_p7) target bundleno = 4 (0x4), region = 88 }
 0x1d7   :  { %541 = vsyncpa [#allocation4], 1 }
 0x1d8   :  { %543 = vsyncpa [#allocation4 + $0x1], 1 }
 0x1d9   :  { %544 = vsyncpa [#allocation5], 1 }
 0x1da   :  { %546 = vsyncpa [#allocation5 + $0x1], 1 }

</bundles_post_ra>
